<compile_context>
chip_gen: v5e
topology: v5e:2x2
jax: 0.10.0
libtpu: 0.0.40
codegen_flags: <defaults>
</compile_context>

<pallas_src>
import functools

import jax
import jax.numpy as jnp
from jax.experimental import pallas as pl
from jax.experimental.pallas import tpu as pltpu

_MIB = 1024 * 1024


def _vmem_capacity_bytes():
    """Generation-aware VMEM capacity (64 MiB/TC on v7x, 128 MiB on v5e/v6e)."""
    try:
        return int(pltpu.get_tpu_info().vmem_capacity_bytes)
    except Exception:
        return 64 * _MIB  # conservative (v7x per-TC) fallback


# ---------------------------------------------------------------------------
# Fused fast path: whole (B, H, N) resident in VMEM. 1 HBM read + 1 write.
# ---------------------------------------------------------------------------
def _fused_kernel(x_ref, gamma_ref, beta_ref, o_ref, *, count, eps):
    x = x_ref[...].astype(jnp.float32)                                  # (B, H, N)
    s = jnp.sum(jnp.sum(x, axis=2, keepdims=True), axis=0, keepdims=True)
    mean = s / count                                                    # (1, H, 1)
    xc = x - mean
    v = jnp.sum(jnp.sum(xc * xc, axis=2, keepdims=True), axis=0, keepdims=True)
    var = v / count                                                     # biased, exact two-pass
    scale = gamma_ref[...] * jax.lax.rsqrt(var + eps)                   # rsqrt -> EUP slot
    o_ref[...] = (xc * scale + beta_ref[...]).astype(o_ref.dtype)


# ---------------------------------------------------------------------------
# Streaming pass 1: per-(batch, channel) partial sums, lane-dense accumulator.
# ---------------------------------------------------------------------------
def _stats_kernel(x_ref, sum_ref, sq_ref, *, n_total, tile_n, ragged):
    n_idx = pl.program_id(1)

    @pl.when(n_idx == 0)
    def _init():
        sum_ref[...] = jnp.zeros_like(sum_ref)
        sq_ref[...] = jnp.zeros_like(sq_ref)

    lw = sum_ref.shape[-1]          # 128 (or N when N <= 128)
    k = tile_n // lw                # static chunk count per tile
    base = n_idx * tile_n           # global node offset of this tile

    def body(m, carry):
        off = pl.multiple_of(m * lw, lw)
        chunk = x_ref[0, :, pl.ds(off, lw)].astype(jnp.float32)        # (H, lw)
        if ragged:
            lane = jax.lax.broadcasted_iota(jnp.int32, chunk.shape, 1)
            chunk = jnp.where(base + off + lane < n_total, chunk, 0.0)
        sum_ref[...] += chunk[None]
        sq_ref[...] += (chunk * chunk)[None]
        return carry

    jax.lax.fori_loop(0, k, body, 0, unroll=(True if k <= 16 else 8))


# ---------------------------------------------------------------------------
# Streaming pass 2: y = x * scale + shift (pure HBM-streaming FMA).
# ---------------------------------------------------------------------------
def _norm_kernel(x_ref, scale_ref, shift_ref, o_ref):
    o_ref[...] = (x_ref[...] * scale_ref[...] + shift_ref[...]).astype(o_ref.dtype)


def _pick_tile_n(N, H, itemsize, target_bytes):
    """Node-axis tile width: multiple of 128 (or all of N when N <= 128),
    never wider than N, sized to ~target_bytes per (1, H, tn) tile."""
    if N <= 128:
        return N
    row_bytes = max(1, H * itemsize)
    cap = max(128, (target_bytes // row_bytes) // 128 * 128)
    return min(cap, (N // 128) * 128)


def batch_norm_node(x, gamma, beta, *, eps=1e-5, force_tiled=False,
                    tile_target_bytes=None):
    """x: (B, H, N) -> (B, H, N); matches nn.BatchNorm1d(H, track_running_stats=False)."""
    B, H, N = x.shape
    itemsize = jnp.dtype(x.dtype).itemsize
    cap = _vmem_capacity_bytes()
    vmem_limit = int(min(cap * 3 // 4, 96 * _MIB))

    gamma3 = gamma.astype(jnp.float32).reshape(1, H, 1)
    beta3 = beta.astype(jnp.float32).reshape(1, H, 1)
    count = float(B * N)

    # ---- Fused single-kernel fast path (small / medium inputs). -------------
    x_bytes = B * H * N * itemsize
    f32_bytes = B * H * N * 4
    fused_footprint = 2 * x_bytes + 2 * f32_bytes      # in + out blocks + fp32 temps
    if (not force_tiled) and fused_footprint <= int(cap * 0.4):
        return pl.pallas_call(
            functools.partial(_fused_kernel, count=count, eps=eps),
            out_shape=jax.ShapeDtypeStruct((B, H, N), x.dtype),
            in_specs=[
                pl.BlockSpec(memory_space=pltpu.MemorySpace.VMEM),
                pl.BlockSpec(memory_space=pltpu.MemorySpace.VMEM),
                pl.BlockSpec(memory_space=pltpu.MemorySpace.VMEM),
            ],
            out_specs=pl.BlockSpec(memory_space=pltpu.MemorySpace.VMEM),
            compiler_params=pltpu.CompilerParams(vmem_limit_bytes=vmem_limit),
        )(x, gamma3, beta3)

    # ---- Streaming two-pass path (large inputs). -----------------------------
    if tile_target_bytes is None:
        tile_target_bytes = min(4 * _MIB, cap // 16)
    tn = _pick_tile_n(N, H, itemsize, tile_target_bytes)
    nt = pl.cdiv(N, tn)
    ragged = (N % tn) != 0
    lw = tn if tn <= 128 else 128

    # Pass 1: fp32 per-(batch, channel) lane-dense partial sum / sum-of-squares.
    psum, psq = pl.pallas_call(
        functools.partial(_stats_kernel, n_total=N, tile_n=tn, ragged=ragged),
        out_shape=(
            jax.ShapeDtypeStruct((B, H, lw), jnp.float32),
            jax.ShapeDtypeStruct((B, H, lw), jnp.float32),
        ),
        grid=(B, nt),
        in_specs=[pl.BlockSpec((1, H, tn), lambda b, n: (b, 0, n))],
        out_specs=(
            pl.BlockSpec((1, H, lw), lambda b, n: (b, 0, 0)),
            pl.BlockSpec((1, H, lw), lambda b, n: (b, 0, 0)),
        ),
        compiler_params=pltpu.CompilerParams(
            dimension_semantics=("parallel", "arbitrary"),
            vmem_limit_bytes=vmem_limit),
    )(x)

    # Finalize: tiny (H,)-sized math in plain JAX (shapes reaching this path are
    # large, so this is negligible; small shapes took the fused path above).
    s = jnp.sum(psum, axis=(0, 2))
    sq = jnp.sum(psq, axis=(0, 2))
    mean = s / count
    var = jnp.maximum(sq / count - mean * mean, 0.0)   # biased variance, clamped
    inv_std = jax.lax.rsqrt(var + eps)
    g = gamma.astype(jnp.float32)
    b_ = beta.astype(jnp.float32)
    scale = (g * inv_std).reshape(1, H, 1)
    shift = (b_ - mean * g * inv_std).reshape(1, H, 1)

    # Pass 2: stream tiles, fused per-channel scale/shift (both axes parallel).
    out = pl.pallas_call(
        _norm_kernel,
        out_shape=jax.ShapeDtypeStruct((B, H, N), x.dtype),
        grid=(B, nt),
        in_specs=[
            pl.BlockSpec((1, H, tn), lambda b, n: (b, 0, n)),
            pl.BlockSpec((1, H, 1), lambda b, n: (0, 0, 0)),   # resident across grid
            pl.BlockSpec((1, H, 1), lambda b, n: (0, 0, 0)),   # resident across grid
        ],
        out_specs=pl.BlockSpec((1, H, tn), lambda b, n: (b, 0, n)),
        compiler_params=pltpu.CompilerParams(
            dimension_semantics=("parallel", "parallel"),
            vmem_limit_bytes=vmem_limit),
    )(x, scale, shift)
    return out


def _reference(x, gamma, beta, eps=1e-5):
    # Pure-JAX reference of BatchNorm1d on (B, C, L) with batch statistics.
    mean = jnp.mean(x, axis=(0, 2), keepdims=True)
    var = jnp.mean((x - mean) ** 2, axis=(0, 2), keepdims=True)  # biased
    return (x - mean) / jnp.sqrt(var + eps) * gamma[None, :, None] + beta[None, :, None]


if __name__ == "__main__":
    key = jax.random.PRNGKey(0)
    k1, k2, k3 = jax.random.split(key, 3)

    # Small shape implied by the module: (batch, hidden_dim, num_nodes).
    batch_size, hidden_dim, num_nodes = 2, 32, 8
    x = jax.random.normal(k1, (batch_size, hidden_dim, num_nodes), dtype=jnp.float32)

    # PyTorch BatchNorm1d default affine params: weight=1, bias=0.
    gamma = jnp.ones((hidden_dim,), dtype=jnp.float32)
    beta = jnp.zeros((hidden_dim,), dtype=jnp.float32)

    # Fused fast path.
    out = jax.block_until_ready(batch_norm_node(x, gamma, beta))
    ref = _reference(x, gamma, beta)
    assert out.shape == (batch_size, hidden_dim, num_nodes)
    assert jnp.allclose(out, ref, atol=1e-5, rtol=1e-5)

    # Streaming path: ragged multi-tile N (exercises cdiv grid + lane masking).
    x2 = jax.random.normal(k2, (2, hidden_dim, 600), dtype=jnp.float32)
    out2 = jax.block_until_ready(
        batch_norm_node(x2, gamma, beta, force_tiled=True, tile_target_bytes=16 * 1024))
    assert jnp.allclose(out2, _reference(x2, gamma, beta), atol=1e-4, rtol=1e-4)

    # Streaming path: multi-chunk (k > 1) lane-dense accumulation, exact N.
    x3 = jax.random.normal(k3, (2, hidden_dim, 1024), dtype=jnp.float32)
    out3 = jax.block_until_ready(
        batch_norm_node(x3, gamma, beta, force_tiled=True, tile_target_bytes=256 * 1024))
    assert jnp.allclose(out3, _reference(x3, gamma, beta), atol=1e-4, rtol=1e-4)

    print("KERNEL_OK")
</pallas_src>

<mosaic_0001>
module attributes {stable_mosaic.version = 11 : i64} {
  func.func @_fused_kernel(%arg0: memref<2x32x8xf32, #tpu.memory_space<vmem>>, %arg1: memref<1x32x1xf32, #tpu.memory_space<vmem>>, %arg2: memref<1x32x1xf32, #tpu.memory_space<vmem>>, %arg3: memref<2x32x8xf32, #tpu.memory_space<vmem>>) attributes {dimension_semantics = [], scalar_prefetch = 0 : i64, scratch_operands = 0 : i64, tpu.core_type = #tpu.core_type<tc>} {
    %c0 = arith.constant 0 : index
    %c0_0 = arith.constant 0 : index
    %c0_1 = arith.constant 0 : index
    %0 = vector.load %arg0[%c0, %c0_0, %c0_1] : memref<2x32x8xf32, #tpu.memory_space<vmem>>, vector<2x32x8xf32>
    %cst = arith.constant dense<0.000000e+00> : vector<2x32xf32>
    %1 = vector.multi_reduction <add>, %0, %cst [2] : vector<2x32x8xf32> to vector<2x32xf32>
    %2 = vector.shape_cast %1 : vector<2x32xf32> to vector<2x32x1xf32>
    %cst_2 = arith.constant dense<0.000000e+00> : vector<32x1xf32>
    %3 = vector.multi_reduction <add>, %2, %cst_2 [0] : vector<2x32x1xf32> to vector<32x1xf32>
    %4 = vector.shape_cast %3 : vector<32x1xf32> to vector<1x32x1xf32>
    %cst_3 = arith.constant 1.600000e+01 : f32
    %5 = vector.broadcast %cst_3 : f32 to vector<1x32x1xf32>
    %6 = arith.divf %4, %5 : vector<1x32x1xf32>
    %7 = vector.broadcast %6 : vector<1x32x1xf32> to vector<2x32x8xf32>
    %8 = arith.subf %0, %7 : vector<2x32x8xf32>
    %9 = arith.mulf %8, %8 : vector<2x32x8xf32>
    %cst_4 = arith.constant dense<0.000000e+00> : vector<2x32xf32>
    %10 = vector.multi_reduction <add>, %9, %cst_4 [2] : vector<2x32x8xf32> to vector<2x32xf32>
    %11 = vector.shape_cast %10 : vector<2x32xf32> to vector<2x32x1xf32>
    %cst_5 = arith.constant dense<0.000000e+00> : vector<32x1xf32>
    %12 = vector.multi_reduction <add>, %11, %cst_5 [0] : vector<2x32x1xf32> to vector<32x1xf32>
    %13 = vector.shape_cast %12 : vector<32x1xf32> to vector<1x32x1xf32>
    %cst_6 = arith.constant 1.600000e+01 : f32
    %14 = vector.broadcast %cst_6 : f32 to vector<1x32x1xf32>
    %15 = arith.divf %13, %14 : vector<1x32x1xf32>
    %c0_7 = arith.constant 0 : index
    %c0_8 = arith.constant 0 : index
    %c0_9 = arith.constant 0 : index
    %16 = vector.load %arg1[%c0_7, %c0_8, %c0_9] : memref<1x32x1xf32, #tpu.memory_space<vmem>>, vector<1x32x1xf32>
    %cst_10 = arith.constant 9.99999974E-6 : f32
    %17 = vector.broadcast %cst_10 : f32 to vector<1x32x1xf32>
    %18 = arith.addf %15, %17 : vector<1x32x1xf32>
    %19 = math.rsqrt %18 : vector<1x32x1xf32>
    %20 = arith.mulf %16, %19 : vector<1x32x1xf32>
    %21 = vector.broadcast %20 : vector<1x32x1xf32> to vector<2x32x8xf32>
    %22 = arith.mulf %8, %21 : vector<2x32x8xf32>
    %c0_11 = arith.constant 0 : index
    %c0_12 = arith.constant 0 : index
    %c0_13 = arith.constant 0 : index
    %23 = vector.load %arg2[%c0_11, %c0_12, %c0_13] : memref<1x32x1xf32, #tpu.memory_space<vmem>>, vector<1x32x1xf32>
    %24 = vector.broadcast %23 : vector<1x32x1xf32> to vector<2x32x8xf32>
    %25 = arith.addf %22, %24 : vector<2x32x8xf32>
    %c0_14 = arith.constant 0 : index
    %c0_15 = arith.constant 0 : index
    %c0_16 = arith.constant 0 : index
    %26 = vector.load %arg3[%c0_14, %c0_15, %c0_16] : memref<2x32x8xf32, #tpu.memory_space<vmem>>, vector<2x32x8xf32>
    tpu.vector_store %arg3[%c0_14, %c0_15, %c0_16], %25 {strides = array<i32>} : memref<2x32x8xf32, #tpu.memory_space<vmem>>, vector<2x32x8xf32>,
    return
  }
}

</mosaic_0001>

<bundles_post_ra>
// kernel: tpu_custom_call.1
= control target key start
LH: loop header
LB: loop body
LE: loop exit
PB: predicated region body
PF: predicated region fallthrough
CT: control target
= control target key end

     0   :  { %vm22_vm0 = vcmask 64512   ;;  %v249_v16 = vmov 16.0   ;;  %s417_s0 = inlined_call_operand.vmem [shape: f32[2,32,8], index: 0, kind: input, shape index: {}]   ;;  %s418_s1 = inlined_call_operand.vmem [shape: f32[1,32,1], index: 1, kind: input, shape index: {}]   ;;  %s419_s2 = inlined_call_operand.vmem [shape: f32[1,32,1], index: 2, kind: input, shape index: {}]   ;;  %s420_s3 = inlined_call_operand.vmem [shape: f32[2,32,8], index: 3, kind: output, shape index: {}]  }
   0x1   :  { %v18_v0 = vld [vmem:[%s417_s0 + $0x20] sm:$0xff]  ;;  %v16_v1 = vld [vmem:[%s417_s0 + $0x10] sm:$0xff]  ;;  %v19_v6 = vld [vmem:[%s417_s0 + $0x28] sm:$0xff]  ;;  %239 = vrcp.f32 %v249_v16 }
   0x2   :  { %v14_v2 = vld [vmem:[%s417_s0] sm:$0xff]  ;;  %v35_v3 = vsel %vm22_vm0, %v18_v0, 0.0  ;;  %v29_v4 = vsel %vm22_vm0, %v16_v1, 0.0  ;;  %v17_v7 = vld [vmem:[%s417_s0 + $0x18] sm:$0xff]  ;;  %v15_v8 = vld [vmem:[%s417_s0 + $0x8] sm:$0xff]  ;;  %v38_v9 = vsel %vm22_vm0, %v19_v6, 0.0 }
   0x3   :  { %v23_v5 = vsel %vm22_vm0, %v14_v2, 0.0  ;;  %36 = vadd.xlane.f32.xlu2 %v35_v3  ;;  %30 = vadd.xlane.f32.xlu1 %v29_v4  ;;  %v32_v10 = vsel %vm22_vm0, %v17_v7, 0.0  ;;  %v26_v11 = vsel %vm22_vm0, %v15_v8, 0.0  ;;  %v21_v12 = vld [vmem:[%s417_s0 + $0x38] sm:$0xff]  ;;  %v20_v13 = vld [vmem:[%s417_s0 + $0x30] sm:$0xff] }
   0x4   :  { %24 = vadd.xlane.f32.xlu0 %v23_v5  ;;  %v44_v14 = vsel %vm22_vm0, %v21_v12, 0.0  ;;  %v41_v15 = vsel %vm22_vm0, %v20_v13, 0.0 }
   0x7   :  { %v240_v17 = vpop.eup %239 }
   0x8   :  { %v52_v18 = vmul.f32 16.0, %v240_v17  ;;  %vm56_vm1 = vweird.f32 %v240_v17 }
   0xa   :  { %v53_v19 = vsub.f32 1.0, %v52_v18 }
   0xb   :  { %39 = vadd.xlane.f32.xlu2 %v38_v9  ;;  %33 = vadd.xlane.f32.xlu1 %v32_v10 }
   0xc   :  { %27 = vadd.xlane.f32.xlu0 %v26_v11  ;;  %v54_v20 = vmul.f32 %v240_v17, %v53_v19 }
   0xe   :  { %v55_v21 = vadd.f32 %v240_v17, %v54_v20 }
  0x10   :  { %v303_v24 = vsel %vm56_vm1, %v240_v17, %v55_v21 }
  0x13   :  { %45 = vadd.xlane.f32.xlu1 %v44_v14 }
  0x14   :  { %42 = vadd.xlane.f32.xlu0 %v41_v15 }
  0x76   :  { %v37_v22 = vpop.xlane.xlu2 %36  ;;  %v31_v23 = vpop.xlane.xlu1 %30 }
  0x77   :  { %v25_v25 = vpop.xlane.xlu0 %24 }
  0x78   :  { %v47_v26 = vadd.f32 %v37_v22, %v25_v25 }
  0x7a   :  { %v58_v27 = vmul.f32 %v303_v24, %v47_v26 }
  0x7c   :  { %v306_v28 = vsub.f32 %v14_v2, %v58_v27  ;;  %v317_v43 = vsub.f32 %v18_v0, %v58_v27 }
  0x7e   :  { %v40_v29 = vpop.xlane.xlu2 %39  ;;  %v34_v30 = vpop.xlane.xlu1 %33  ;;  %v70_v31 = vmul.f32 %v306_v28, %v306_v28  ;;  %v74_v47 = vmul.f32 %v317_v43, %v317_v43 }
  0x7f   :  { %v28_v32 = vpop.xlane.xlu0 %27 }
  0x80   :  { %v48_v33 = vadd.f32 %v40_v29, %v28_v32  ;;  %v78_v34 = vsel %vm22_vm0, %v70_v31, 0.0  ;;  %v90_v53 = vsel %vm22_vm0, %v74_v47, 0.0 }
  0x81   :  { %79 = vadd.xlane.f32.xlu2 %v78_v34 }
  0x82   :  { %v59_v35 = vmul.f32 %v303_v24, %v48_v33 }
  0x84   :  { %v312_v36 = vsub.f32 %v15_v8, %v59_v35  ;;  %v338_v56 = vsub.f32 %v19_v6, %v59_v35 }
  0x86   :  { %v46_v37 = vpop.xlane.xlu1 %45  ;;  %v71_v38 = vmul.f32 %v312_v36, %v312_v36  ;;  %v75_v59 = vmul.f32 %v338_v56, %v338_v56 }
  0x87   :  { %v50_v39 = vadd.f32 %v46_v37, %v34_v30  ;;  %v43_v40 = vpop.xlane.xlu0 %42 }
  0x88   :  { %v49_v41 = vadd.f32 %v43_v40, %v31_v23  ;;  %v81_v42 = vsel %vm22_vm0, %v71_v38, 0.0  ;;  %v93_v62 = vsel %vm22_vm0, %v75_v59, 0.0 }
  0x89   :  { %v61_v44 = vmul.f32 %v303_v24, %v50_v39  ;;  %82 = vadd.xlane.f32.xlu0 %v81_v42 }
  0x8a   :  { %v60_v45 = vmul.f32 %v303_v24, %v49_v41 }
  0x8b   :  { %v321_v46 = vsub.f32 %v17_v7, %v61_v44  ;;  %v336_v55 = vsub.f32 %v21_v12, %v61_v44  ;;  %v112_v44 = vld [vmem:[%s418_s1 + $0x10] sm:$0xff] }
  0x8c   :  { %v325_v48 = vsub.f32 %v16_v1, %v60_v45  ;;  %v332_v52 = vsub.f32 %v20_v13, %v60_v45  ;;  %v250_v1 = vmov 0  }
  0x8d   :  { %v73_v49 = vmul.f32 %v321_v46, %v321_v46  ;;  %v77_v58 = vmul.f32 %v336_v55, %v336_v55  ;;  %236 = vset.pattern.permute.xlu1 %v250_v1  ;;  %238 = vset.pattern.permute.xlu0 %v250_v1 }
  0x8e   :  { %v72_v50 = vmul.f32 %v325_v48, %v325_v48  ;;  %v76_v57 = vmul.f32 %v332_v52, %v332_v52  ;;  %237 = vset.pattern.permute.xlu2 %v250_v1 }
  0x8f   :  { %v87_v51 = vsel %vm22_vm0, %v73_v49, 0.0  ;;  %v99_v61 = vsel %vm22_vm0, %v77_v58, 0.0  ;;  %v111_v49 = vld [vmem:[%s418_s1 + $0x8] sm:$0xff] }
  0x90   :  { %88 = vadd.xlane.f32.xlu2 %v87_v51  ;;  %v84_v54 = vsel %vm22_vm0, %v72_v50, 0.0  ;;  %v96_v60 = vsel %vm22_vm0, %v76_v57, 0.0  ;;  %v190_v57 = vld [vmem:[%s419_s2] sm:$0xff] }
  0x91   :  { %91 = vadd.xlane.f32.xlu0 %v90_v53  ;;  %85 = vadd.xlane.f32.xlu1 %v84_v54 }
  0x98   :  { %97 = vadd.xlane.f32.xlu2 %v96_v60 }
  0x99   :  { %100 = vadd.xlane.f32.xlu0 %v99_v61  ;;  %94 = vadd.xlane.f32.xlu1 %v93_v62  ;;  %v191_v61 = vld [vmem:[%s419_s2 + $0x8] sm:$0xff]  ;;  %v192_v62 = vld [vmem:[%s419_s2 + $0x10] sm:$0xff] }
  0xf4   :  { %v80_v63 = vpop.xlane.xlu2 %79 }
  0xfc   :  { %v83_v0 = vpop.xlane.xlu0 %82 }
 0x103   :  { %v89_v2 = vpop.xlane.xlu2 %88 }
 0x104   :  { %v86_v3 = vpop.xlane.xlu1 %85  ;;  %v92_v4 = vpop.xlane.xlu0 %91 }
 0x105   :  { %v102_v5 = vadd.f32 %v92_v4, %v80_v63 }
 0x107   :  { %v106_v6 = vmul.f32 %v102_v5, %v303_v24 }
 0x109   :  { %v114_v7 = vadd.f32 1e-05, %v106_v6 }
 0x10b   :  { %241 = vrsqrt.f32 %v114_v7  ;;  %v98_v8 = vpop.xlane.xlu2 %97  ;;  %vm124_vm3 = vweird.f32 %v114_v7 }
 0x10c   :  { %v104_v9 = vadd.f32 %v98_v8, %v86_v3  ;;  %v95_v10 = vpop.xlane.xlu1 %94  ;;  %v101_v11 = vpop.xlane.xlu0 %100  ;;  %v193_v3 = vld [vmem:[%s419_s2 + $0x18] sm:$0xff] }
 0x10d   :  { %v103_v12 = vadd.f32 %v95_v10, %v83_v0  ;;  %v105_v13 = vadd.f32 %v101_v11, %v89_v2  ;;  %v113_v0 = vld [vmem:[%s418_s1 + $0x18] sm:$0xff] }
 0x10e   :  { %v108_v14 = vmul.f32 %v104_v9, %v303_v24 }
 0x10f   :  { %v107_v15 = vmul.f32 %v103_v12, %v303_v24  ;;  %v109_v16 = vmul.f32 %v105_v13, %v303_v24  ;;  %v110_v24 = vld [vmem:[%s418_s1] sm:$0xff] }
 0x110   :  { %v116_v17 = vadd.f32 1e-05, %v108_v14 }
 0x111   :  { %v242_v18 = vpop.eup %241  ;;  %v115_v19 = vadd.f32 1e-05, %v107_v15  ;;  %v117_v20 = vadd.f32 1e-05, %v109_v16 }
 0x112   :  { %v119_v21 = vmul.f32 %v242_v18, %v114_v7  ;;  %243 = vrsqrt.f32 %v116_v17  ;;  %vm125_vm2 = vweird.f32 %v242_v18  ;;  %vm144_vm7 = vweird.f32 %v116_v17 }
 0x113   :  { %245 = vrsqrt.f32 %v115_v19  ;;  %vm126_vm4 = vmor %vm124_vm3, %vm125_vm2  ;;  %vm134_vm8 = vweird.f32 %v115_v19  ;;  %vm154_vm12 = vweird.f32 %v117_v20 }
 0x114   :  { %v120_v22 = vmul.f32 %v242_v18, %v119_v21  ;;  %247 = vrsqrt.f32 %v117_v20 }
 0x116   :  { %v121_v23 = vmul.f32 0.5, %v120_v22 }
 0x118   :  { %v244_v25 = vpop.eup %243  ;;  %v122_v26 = vsub.f32 1.5, %v121_v23 }
 0x119   :  { %v246_v27 = vpop.eup %245  ;;  %v139_v29 = vmul.f32 %v244_v25, %v116_v17  ;;  %vm145_vm5 = vweird.f32 %v244_v25 }
 0x11a   :  { %v129_v30 = vmul.f32 %v246_v27, %v115_v19  ;;  %v123_v31 = vmul.f32 %v242_v18, %v122_v26  ;;  %v248_v32 = vpop.eup %247  ;;  %vm135_vm6 = vweird.f32 %v246_v27  ;;  %vm146_vm9 = vmor %vm144_vm7, %vm145_vm5 }
 0x11b   :  { %v140_v33 = vmul.f32 %v244_v25, %v139_v29  ;;  %v149_v40 = vmul.f32 %v248_v32, %v117_v20  ;;  %vm136_vm10 = vmor %vm134_vm8, %vm135_vm6  ;;  %vm155_vm11 = vweird.f32 %v248_v32 }
 0x11c   :  { %v130_v34 = vmul.f32 %v246_v27, %v129_v30  ;;  %v127_v35 = vsel %vm126_vm4, %v242_v18, %v123_v31  ;;  %vm156_vm13 = vmor %vm154_vm12, %vm155_vm11 }
 0x11d   :  { %v141_v37 = vmul.f32 0.5, %v140_v33  ;;  %v158_v38 = vmul.f32 %v127_v35, %v110_v24  ;;  %v150_v47 = vmul.f32 %v248_v32, %v149_v40 }
 0x11e   :  { %v131_v39 = vmul.f32 0.5, %v130_v34 }
 0x11f   :  { %v142_v41 = vsub.f32 1.5, %v141_v37  ;;  %164 = vperm.xlu1 %236, %v158_v38   ;;  %v151_v59 = vmul.f32 0.5, %v150_v47 }
 0x120   :  { %v132_v42 = vsub.f32 1.5, %v131_v39 }
 0x121   :  { %v143_v45 = vmul.f32 %v244_v25, %v142_v41  ;;  %v152_v60 = vsub.f32 1.5, %v151_v59 }
 0x122   :  { %v133_v50 = vmul.f32 %v246_v27, %v132_v42 }
 0x123   :  { %v147_v51 = vsel %vm146_vm9, %v244_v25, %v143_v45  ;;  %v153_v63 = vmul.f32 %v248_v32, %v152_v60 }
 0x124   :  { %v160_v53 = vmul.f32 %v147_v51, %v112_v44  ;;  %v137_v54 = vsel %vm136_vm10, %v246_v27, %v133_v50 }
 0x125   :  { %v159_v58 = vmul.f32 %v137_v54, %v111_v49  ;;  %v157_v1 = vsel %vm156_vm13, %v248_v32, %v153_v63 }
 0x126   :  { %174 = vperm.xlu0 %238, %v160_v53   ;;  %v161_v2 = vmul.f32 %v157_v1, %v113_v0 }
 0x127   :  { %169 = vperm.xlu2 %237, %v159_v58   ;;  %196 = vperm.xlu1 %236, %v190_v57  }
 0x12f   :  { %201 = vperm.xlu2 %237, %v191_v61   ;;  %206 = vperm.xlu1 %236, %v192_v62  }
 0x137   :  { %179 = vperm.xlu2 %237, %v161_v2  }
 0x13f   :  { %211 = vperm.xlu2 %237, %v193_v3  }
 0x181   :  { %v170_v4 = vpop.permute.xlu2 %169 }
 0x182   :  { %v183_v5 = vmul.f32 %v170_v4, %v312_v36  ;;  %v187_v6 = vmul.f32 %v170_v4, %v338_v56 }
 0x189   :  { %v202_v7 = vpop.permute.xlu2 %201 }
 0x18a   :  { %v215_v8 = vadd.f32 %v202_v7, %v183_v5  ;;  %v219_v9 = vadd.f32 %v202_v7, %v187_v6 }
 0x18c   :  { %223 = vst.msk [vmem:[%s420_s3 + $0x8] sm:$0xff] %vm22_vm0, %v215_v8 }
 0x18d   :  { %227 = vst.msk [vmem:[%s420_s3 + $0x28] sm:$0xff] %vm22_vm0, %v219_v9 }
 0x191   :  { %v165_v10 = vpop.permute.xlu1 %164  ;;  %v180_v11 = vpop.permute.xlu2 %179 }
 0x192   :  { %v182_v12 = vmul.f32 %v165_v10, %v306_v28  ;;  %v186_v36 = vmul.f32 %v165_v10, %v317_v43  ;;  %v185_v56 = vmul.f32 %v180_v11, %v321_v46  ;;  %v189_v13 = vmul.f32 %v180_v11, %v336_v55 }
 0x198   :  { %v175_v28 = vpop.permute.xlu0 %174 }
 0x199   :  { %v197_v14 = vpop.permute.xlu1 %196  ;;  %v212_v15 = vpop.permute.xlu2 %211  ;;  %v184_v43 = vmul.f32 %v175_v28, %v325_v48  ;;  %v188_v46 = vmul.f32 %v175_v28, %v332_v52 }
 0x19a   :  { %v214_v16 = vadd.f32 %v197_v14, %v182_v12  ;;  %v218_v17 = vadd.f32 %v197_v14, %v186_v36  ;;  %v217_v18 = vadd.f32 %v212_v15, %v185_v56  ;;  %v221_v19 = vadd.f32 %v212_v15, %v189_v13 }
 0x19c   :  { %222 = vst.msk [vmem:[%s420_s3] sm:$0xff] %vm22_vm0, %v214_v16 }
 0x19d   :  { %226 = vst.msk [vmem:[%s420_s3 + $0x20] sm:$0xff] %vm22_vm0, %v218_v17 }
 0x19e   :  { %225 = vst.msk [vmem:[%s420_s3 + $0x18] sm:$0xff] %vm22_vm0, %v217_v18 }
 0x19f   :  { %229 = vst.msk [vmem:[%s420_s3 + $0x38] sm:$0xff] %vm22_vm0, %v221_v19 }
 0x1a1   :  { %v207_v55 = vpop.permute.xlu1 %206 }
 0x1a2   :  { %v216_v20 = vadd.f32 %v207_v55, %v184_v43  ;;  %v220_v21 = vadd.f32 %v207_v55, %v188_v46 }
 0x1a4   :  { %224 = vst.msk [vmem:[%s420_s3 + $0x10] sm:$0xff] %vm22_vm0, %v216_v20 }
 0x1a5   :  { %228 = vst.msk [vmem:[%s420_s3 + $0x30] sm:$0xff] %vm22_vm0, %v220_v21 }

</bundles_post_ra>
